<compile_context>
chip_gen: v7x
topology: tpu7x:2x2x1
jax: 0.10.0
libtpu: 0.0.40
codegen_flags: <defaults>
</compile_context>

<pallas_src>
import functools

import jax
import jax.numpy as jnp
import numpy as np
from jax.experimental import pallas as pl
from jax.experimental.pallas import tpu as pltpu

NUM_JOINTS = 15
LATENT_DIM = 128
POSE_LATENT_DIM = (NUM_JOINTS + 1) * 3          # 48
INPUT_DIM = (NUM_JOINTS + 1) * 6 + 3            # 99
HIDDEN_DIM = (POSE_LATENT_DIM + 3) * 2          # 102  (multiHandFinal out)
OUT_DIM = 2 * INPUT_DIM                         # 198  (both hands concatenated)

MAX_SEQ_TILE = 2048                             # rows handled per grid step (cap)


def _output_process_kernel(x_ref, w_ref, b_ref, o_ref):
    # x_ref : (TS, 128)   w_ref : (128, 198)   b_ref : (1, 198)   o_ref : (TS, 198)
    o = jnp.dot(x_ref[...], w_ref[...], preferred_element_type=jnp.float32)
    o_ref[...] = (o + b_ref[...]).astype(o_ref.dtype)


def fuse_output_params(params):
    """Fold multiHandFinal + transFinal + poseFinal into ONE affine map.

    Exact (no nonlinearity between the layers):
      wc (102,198) block layout:
        cols [0:3]    = transFinal(hand1)   cols [3:99]    = poseFinal(hand1)
        cols [99:102] = transFinal(hand2)   cols [102:198] = poseFinal(hand2)
      W = w1 @ wc   (128, 198)
      b = b1 @ wc + bc   (198,)
    Call once, outside the per-step path.
    """
    w1 = params["w1"].astype(jnp.float32)        # (128, 102)
    b1 = params["b1"].astype(jnp.float32)        # (102,)
    wt = params["wt"].astype(jnp.float32)        # (3, 3)
    bt = params["bt"].astype(jnp.float32)        # (3,)
    wp = params["wp"].astype(jnp.float32)        # (48, 96)
    bp = params["bp"].astype(jnp.float32)        # (96,)

    wc = jnp.zeros((HIDDEN_DIM, OUT_DIM), dtype=jnp.float32)
    wc = wc.at[0:3, 0:3].set(wt)                                  # hand1 trans
    wc = wc.at[3:3 + POSE_LATENT_DIM, 3:INPUT_DIM].set(wp)        # hand1 pose
    wc = wc.at[51:54, 99:102].set(wt)                             # hand2 trans
    wc = wc.at[54:102, 102:198].set(wp)                           # hand2 pose
    bc = jnp.concatenate([bt, bp, bt, bp])                        # (198,)

    w_total = w1 @ wc                                             # (128, 198)
    b_total = b1 @ wc + bc                                        # (198,)
    return dict(w=w_total, b=b_total.reshape(1, OUT_DIM))


def _pick_seq_tile(seqlen, bs, max_seq_tile):
    """Large sublane-aligned seq tile; split if grid would be a single step."""
    if seqlen <= max_seq_tile:
        ts = seqlen                               # full dim -> any size is legal
    else:
        ts = max(8, (max_seq_tile // 8) * 8)      # partial tiles must be 8-aligned
    n_seq = -(-seqlen // ts)
    # v7x has 2 TensorCores sharded over parallel grid axes: guarantee >= 2 steps.
    if bs == 1 and n_seq == 1 and seqlen > 8:
        ts = ((((seqlen + 1) // 2) + 7) // 8) * 8
        n_seq = -(-seqlen // ts)
    return int(ts), int(n_seq)


@functools.partial(jax.jit, static_argnames=("max_seq_tile",))
def output_process_handpose(x, fused, *, max_seq_tile=MAX_SEQ_TILE):
    """x: (seqlen, bs, 128) f32, fused = fuse_output_params(params)
       -> (bs, seqlen, 2, 99) f32."""
    seqlen, bs, latent = x.shape
    assert latent == LATENT_DIM

    # Free contiguous reshape: columns [b*128:(b+1)*128] of x2d are x[:, b, :],
    # so the (seqlen,bs)->(bs,seqlen) permute is realized purely by index maps.
    x2d = x.reshape(seqlen, bs * LATENT_DIM)

    ts, n_seq = _pick_seq_tile(seqlen, bs, max_seq_tile)
    grid = (n_seq, bs)   # bs innermost: adjacent steps read adjacent batch cols

    out3d = pl.pallas_call(
        _output_process_kernel,
        out_shape=jax.ShapeDtypeStruct((bs, seqlen, OUT_DIM), jnp.float32),
        grid=grid,
        in_specs=[
            # x[:, b, :] tile as a plain 2-D (ts, 128) block of (seqlen, bs*128).
            pl.BlockSpec((ts, LATENT_DIM), lambda i, b: (i, b)),
            # Fused weight/bias: constant block index -> DMA'd once, VMEM-resident.
            pl.BlockSpec((LATENT_DIM, OUT_DIM), lambda i, b: (0, 0)),
            pl.BlockSpec((1, OUT_DIM), lambda i, b: (0, 0)),
        ],
        # Written directly in (bs, seqlen, 198) layout (leading batch dim squeezed):
        # PyTorch's permute(1,0,2) costs no extra HBM pass.
        out_specs=pl.BlockSpec((None, ts, OUT_DIM), lambda i, b: (b, i, 0)),
        compiler_params=pltpu.CompilerParams(
            dimension_semantics=("parallel", "parallel"),
            vmem_limit_bytes=32 * 1024 * 1024),
    )(x2d, fused["w"], fused["b"])

    # (bs, seqlen, 198) -> (bs, seqlen, 2, 99): contiguous split, layout-only.
    return out3d.reshape(bs, seqlen, 2, INPUT_DIM)


def _init_params(key):
    """Deterministic init mimicking nn.Linear (uniform +-1/sqrt(fan_in)).
    Weights stored as (in_features, out_features)."""
    ks = jax.random.split(key, 6)

    def lin(kw, kb, fan_in, fan_out):
        bound = 1.0 / np.sqrt(fan_in)
        w = jax.random.uniform(kw, (fan_in, fan_out), jnp.float32, -bound, bound)
        b = jax.random.uniform(kb, (fan_out,), jnp.float32, -bound, bound)
        return w, b

    w1, b1 = lin(ks[0], ks[1], LATENT_DIM, HIDDEN_DIM)            # multiHandFinal
    wt, bt = lin(ks[2], ks[3], 3, 3)                              # transFinal
    wp, bp = lin(ks[4], ks[5], POSE_LATENT_DIM, INPUT_DIM - 3)    # poseFinal
    return {"w1": w1, "b1": b1, "wt": wt, "bt": bt, "wp": wp, "bp": bp}


def _reference(x, params):
    """Pure-JAX reference mirroring the PyTorch forward op-for-op."""
    seqlen, bs, _ = x.shape
    h = x @ params["w1"] + params["b1"]                           # (S,B,102)
    h = h.reshape(seqlen, bs, 2, POSE_LATENT_DIM + 3)
    hand1, hand2 = h[:, :, 0], h[:, :, 1]

    def per_hand(hand):
        t = hand[..., :3] @ params["wt"] + params["bt"]
        p = hand[..., 3:] @ params["wp"] + params["bp"]
        return jnp.concatenate([t, p], axis=-1)

    o = jnp.concatenate([per_hand(hand1), per_hand(hand2)], axis=-1)
    return jnp.transpose(o, (1, 0, 2)).reshape(bs, seqlen, 2, INPUT_DIM)


def _check(out, ref):
    np.testing.assert_allclose(np.asarray(out), np.asarray(ref),
                               rtol=1e-4, atol=1e-4)


if __name__ == "__main__":
    key = jax.random.PRNGKey(0)
    k_param, k1, k2, k3, k4 = jax.random.split(key, 5)

    params = _init_params(k_param)
    fused = fuse_output_params(params)

    # Case 1: multiple grid steps along batch, sublane-aligned seqlen.
    seqlen, bs = 24, 4
    x = jax.random.normal(k1, (seqlen, bs, LATENT_DIM), jnp.float32)
    out = jax.block_until_ready(output_process_handpose(x, fused))
    assert out.shape == (bs, seqlen, 2, INPUT_DIM), out.shape
    _check(out, _reference(x, params))

    # Case 2: seqlen not a multiple of 8 (full-dim block path).
    seqlen, bs = 20, 2
    x = jax.random.normal(k2, (seqlen, bs, LATENT_DIM), jnp.float32)
    out = jax.block_until_ready(output_process_handpose(x, fused))
    _check(out, _reference(x, params))

    # Case 3: seqlen > tile cap with a ragged last tile (exercised via a small cap).
    seqlen, bs = 44, 3
    x = jax.random.normal(k3, (seqlen, bs, LATENT_DIM), jnp.float32)
    out = jax.block_until_ready(output_process_handpose(x, fused, max_seq_tile=16))
    _check(out, _reference(x, params))

    # Case 4: bs == 1 single-tile shape -> seq axis auto-split into 2 grid steps.
    seqlen, bs = 24, 1
    x = jax.random.normal(k4, (seqlen, bs, LATENT_DIM), jnp.float32)
    out = jax.block_until_ready(output_process_handpose(x, fused))
    _check(out, _reference(x, params))

    print("KERNEL_OK")
</pallas_src>

<mosaic_0001>
module attributes {stable_mosaic.version = 11 : i64} {
  func.func @_output_process_kernel(%arg0: i32, %arg1: i32, %arg2: memref<24x128xf32, #tpu.memory_space<vmem>>, %arg3: memref<128x198xf32, #tpu.memory_space<vmem>>, %arg4: memref<1x198xf32, #tpu.memory_space<vmem>>, %arg5: memref<1x24x198xf32, #tpu.memory_space<vmem>>) attributes {dimension_semantics = [#tpu.dimension_semantics<parallel>, #tpu.dimension_semantics<parallel>], iteration_bounds = array<i64: 1, 4>, scalar_prefetch = 0 : i64, scratch_operands = 0 : i64, tpu.core_type = #tpu.core_type<tc>, window_params = [{transform_indices = @transform_0, window_bounds = array<i64: 24, 128>}, {pipeline_mode = #tpu.pipeline_mode<synchronous>, transform_indices = @transform_1, window_bounds = array<i64: 128, 198>}, {pipeline_mode = #tpu.pipeline_mode<synchronous>, transform_indices = @transform_2, window_bounds = array<i64: 1, 198>}, {transform_indices = @transform_3, window_bounds = array<i64: 1, 24, 198>}]} {
    %c0 = arith.constant 0 : index
    %c0_0 = arith.constant 0 : index
    %0 = vector.load %arg2[%c0, %c0_0] : memref<24x128xf32, #tpu.memory_space<vmem>>, vector<24x128xf32>
    %c0_1 = arith.constant 0 : index
    %c0_2 = arith.constant 0 : index
    %1 = vector.load %arg3[%c0_1, %c0_2] : memref<128x198xf32, #tpu.memory_space<vmem>>, vector<128x198xf32>
    %cst = arith.constant dense<0.000000e+00> : vector<24x198xf32>
    %2 = tpu.matmul %0, %1, %cst {dimension_numbers = #tpu.dot_dimension_numbers<[1], [0], [0], [1], [0, 0, 1, 1], [], []>} : vector<24x128xf32>, vector<128x198xf32>, vector<24x198xf32> -> vector<24x198xf32>
    %c0_3 = arith.constant 0 : index
    %c0_4 = arith.constant 0 : index
    %3 = vector.load %arg4[%c0_3, %c0_4] : memref<1x198xf32, #tpu.memory_space<vmem>>, vector<1x198xf32>
    %4 = vector.broadcast %3 : vector<1x198xf32> to vector<24x198xf32>
    %5 = arith.addf %2, %4 : vector<24x198xf32>
    %c0_5 = arith.constant 0 : index
    %c0_6 = arith.constant 0 : index
    %c0_7 = arith.constant 0 : index
    %6 = vector.load %arg5[%c0_5, %c0_6, %c0_7] : memref<1x24x198xf32, #tpu.memory_space<vmem>>, vector<1x24x198xf32>
    %7 = vector.shape_cast %6 : vector<1x24x198xf32> to vector<24x198xf32>
    %8 = vector.shape_cast %5 : vector<24x198xf32> to vector<1x24x198xf32>
    tpu.vector_store %arg5[%c0_5, %c0_6, %c0_7], %8 {strides = array<i32>} : memref<1x24x198xf32, #tpu.memory_space<vmem>>, vector<1x24x198xf32>,
    return
  }
  func.func @transform_0(%arg0: i32, %arg1: i32) -> (i32, i32) {
    %c0_i32 = arith.constant 0 : i32
    return %arg0, %arg1 : i32, i32
  }
  func.func @transform_1(%arg0: i32, %arg1: i32) -> (i32, i32) {
    %c0_i32 = arith.constant 0 : i32
    %c0_i32_0 = arith.constant 0 : i32
    %c0_i32_1 = arith.constant 0 : i32
    return %c0_i32, %c0_i32_0 : i32, i32
  }
  func.func @transform_2(%arg0: i32, %arg1: i32) -> (i32, i32) {
    %c0_i32 = arith.constant 0 : i32
    %c0_i32_0 = arith.constant 0 : i32
    %c0_i32_1 = arith.constant 0 : i32
    return %c0_i32, %c0_i32_0 : i32, i32
  }
  func.func @transform_3(%arg0: i32, %arg1: i32) -> (i32, i32, i32) {
    %c0_i32 = arith.constant 0 : i32
    %c0_i32_0 = arith.constant 0 : i32
    return %arg1, %arg0, %c0_i32 : i32, i32, i32
  }
}

</mosaic_0001>

<bundles_post_ra>
// kernel: output_process_handpose.1
= control target key start
LH: loop header
LB: loop body
LE: loop exit
PB: predicated region body
PF: predicated region fallthrough
CT: control target
= control target key end

     0   :  { %s638_s12 = smov 0   ;;  %s640_s13 = smov 0   ;;  %s806_s0 = inlined_call_operand.vmem [shape: f32[24,512], index: 0, kind: input, shape index: {}]   ;;  %s807_s1 = inlined_call_operand.vmem [shape: f32[128,198], index: 1, kind: input, shape index: {}]   ;;  %s808_s2 = inlined_call_operand.vmem [shape: f32[1,198], index: 2, kind: input, shape index: {}]   ;;  %s809_s3 = inlined_call_operand.vmem [shape: f32[4,24,198], index: 3, kind: output, shape index: {}]  }
   0x1   :  { %s642_s14 = smov 0   ;;  %s644_s15 = smov 0  }
   0x2   :  { %s646_s16 = smov 0  }
   0x3 LB: > { %s22_s17 = sadd.s32 1, %s611_s15  ;;  %p41_p1 = scmp.ne.s32.totalorder %s603_s13, %s599_s12  ;;  %s615_s16 = sphi %s646_s16, %s13_s16   ;;  %s611_s15 = sphi %s644_s15, %s813_s15   ;;  %s607_s14 = sphi %s642_s14, %s812_s14   ;;  %s603_s13 = sphi %s640_s13, %s811_s13   ;;  %s599_s12 = sphi %s638_s12, %s810_s12  }
   0x4   : > { %p23_p0 = scmp.ge.s32.totalorder %s22_s17, 4  ;;  %p42_p2 = scmp.eq.s32.totalorder %s615_s16, 0 }
   0x5   : > { %s34_s19 = sadd.s32 1, %s603_s13  ;;  %p479_p5 = scmp.ge.s32.totalorder %s615_s16, 4 }
   0x6   : > { %s815_s17 = smov (%p23_p0, %s22_s17), 0  ;;  %p43_p3 = por %p42_p2, %p41_p1 }
   0x7   : > { %s30_s18 = ssub.s32 %s611_s15, %s815_s17  ;;  %143 = sbr.rel (%p479_p5) target bundleno = 21 (0x15), region = 24 }
   0x8   : > { %p32_p4 = scmp.eq.s32.totalorder %s30_s18, 0 }
   0xa   : > { %s673_s20 = scalar_select %p32_p4, %s603_s13, %s34_s19  }
   0xe   : > { %146 = sbr.rel (!%p43_p3) target bundleno = 21 (0x15), region = 28  ;;  %s148_s21 = sand.u32 (%p43_p3), 1, %s603_s13  }
   0xf   : > { %s480_s22 = sshll.u32 (%p43_p3), %s611_s15, 3  ;;  %s533_s23 = smul.u32 (%p43_p3), 24, %s148_s21 }
  0x10   : > { %s155_s26 = scalar_lea.vmem (%p43_p3), %s806_s0, %s480_s22 }
  0x11   : > { %v187_v0 = vld [vmem:[%s155_s26] sm:$0xff] (%p43_p3)  ;;  %s150_s27 = scalar_lea.vmem (%p43_p3), [#allocation2], %s533_s23 }
  0x12   : > { %v189_v1 = vld [vmem:[%s155_s26 + $0x20] sm:$0xff] (%p43_p3)  ;;  %188 = vst [vmem:[%s150_s27] sm:$0xff] (%p43_p3), %v187_v0 }
  0x13   : > { %v191_v2 = vld [vmem:[%s155_s26 + $0x40] sm:$0xff] (%p43_p3)  ;;  %190 = vst [vmem:[%s150_s27 + $0x8] sm:$0xff] (%p43_p3), %v189_v1 }
  0x14   : > { %192 = vst [vmem:[%s150_s27 + $0x10] sm:$0xff] (%p43_p3), %v191_v2 }
  0x15 PF: > { %p481_p6 = scmp.ge.s32.totalorder %s615_s16, 1  ;;  %p197_p7 = scmp.lt.s32.totalorder %s615_s16, 5 }
  0x17   : > { %p198_p8 = pnand %p481_p6, %p197_p7 }
  0x18   : > { %v248_v3 = vld [vmem:[%s807_s1 + $0x8] sm:$0xff] (!%p198_p8)  ;;  %v250_v4 = vld [vmem:[%s807_s1 + $0x18] sm:$0xff] (!%p198_p8)  ;;  %v247_v5 = vld [vmem:[%s807_s1] sm:$0xff] (!%p198_p8)  ;;  %v617_v10 = vmov (!%p198_p8), 0.0   ;;  %s204_s28 = sand.u32 (!%p198_p8), 1, %s599_s12   ;;  %v281_v55 = vlaneseq (!%p198_p8)  ;;  %p234_p9 = scmp.lt.s32.totalorder (!%p198_p8), %s607_s14, 3 }
  0x19   : > { %201 = sbr.rel (%p198_p8) target bundleno = 279 (0x117), region = 66  ;;  %v485_v6 = vpack.c.bf16 (!%p198_p8), %v250_v4, %v248_v3  ;;  %v249_v7 = vld [vmem:[%s807_s1 + $0x10] sm:$0xff] (!%p198_p8)  ;;  %v252_v8 = vld [vmem:[%s807_s1 + $0x28] sm:$0xff] (!%p198_p8)  ;;  %v254_v9 = vld [vmem:[%s807_s1 + $0x38] sm:$0xff] (!%p198_p8)  ;;  %361 = vmatprep.mubr.f32.mxu1 (!%p198_p8), %v617_v10  ;;  %355 = vmatprep.mubr.f32.mxu0 (!%p198_p8), %v617_v10  ;;  %vm375_vm0 = vcmask (!%p198_p8), 572416  }
  0x1a   : > { %v487_v11 = vpack.c.bf16 (!%p198_p8), %v249_v7, %v247_v5  ;;  %v489_v12 = vpack.c.bf16 (!%p198_p8), %v254_v9, %v252_v8  ;;  %v251_v13 = vld [vmem:[%s807_s1 + $0x20] sm:$0xff] (!%p198_p8)  ;;  %v253_v14 = vld [vmem:[%s807_s1 + $0x30] sm:$0xff] (!%p198_p8)  ;;  %v256_v15 = vld [vmem:[%s807_s1 + $0x48] sm:$0xff] (!%p198_p8)  ;;  %s534_s6 = smul.u32 (!%p198_p8), 24, %s204_s28  ;;  %v282_v56 = vshrl.u32 (!%p198_p8), %v281_v55, 7 }
  0x1b   : > { %517 = vmatprep.subr.bf16.mxu1 (!%p198_p8), %v485_v6  ;;  %486 = vmatprep.subr.bf16.mxu0 (!%p198_p8), %v485_v6  ;;  %v258_v16 = vld [vmem:[%s807_s1 + $0x58] sm:$0xff] (!%p198_p8)  ;;  %v491_v17 = vpack.c.bf16 (!%p198_p8), %v253_v14, %v251_v13  ;;  %v255_v19 = vld [vmem:[%s807_s1 + $0x40] sm:$0xff] (!%p198_p8)  ;;  %v257_v20 = vld [vmem:[%s807_s1 + $0x50] sm:$0xff] (!%p198_p8) }
  0x1c   : > { %525 = vmatpush1.bf16.msra.mxu1 (!%p198_p8), %v487_v11  ;;  %488 = vmatpush1.bf16.msra.mxu0 (!%p198_p8), %v487_v11  ;;  %v493_v18 = vpack.c.bf16 (!%p198_p8), %v258_v16, %v256_v15  ;;  %v260_v21 = vld [vmem:[%s807_s1 + $0x68] sm:$0xff] (!%p198_p8)  ;;  %v262_v22 = vld [vmem:[%s807_s1 + $0x78] sm:$0xff] (!%p198_p8)  ;;  %v495_v23 = vpack.c.bf16 (!%p198_p8), %v257_v20, %v255_v19  ;;  %v259_v25 = vld [vmem:[%s807_s1 + $0x60] sm:$0xff] (!%p198_p8)  ;;  %s206_s12 = scalar_lea.vmem (!%p198_p8), [#allocation2], %s534_s6  ;;  %v283_v57 = vsub.s32 (!%p198_p8), 0, %v282_v56  ;;  %v287_v59 = vsub.s32 (!%p198_p8), 1, %v282_v56 }
  0x1d   : > { %518 = vmatprep.subr.bf16.mxu1 (!%p198_p8), %v489_v12  ;;  %490 = vmatprep.subr.bf16.mxu0 (!%p198_p8), %v489_v12  ;;  %v497_v24 = vpack.c.bf16 (!%p198_p8), %v262_v22, %v260_v21  ;;  %v261_v26 = vld [vmem:[%s807_s1 + $0x70] sm:$0xff] (!%p198_p8)  ;;  %v264_v27 = vld [vmem:[%s807_s1 + $0x88] sm:$0xff] (!%p198_p8)  ;;  %v266_v28 = vld [vmem:[%s807_s1 + $0x98] sm:$0xff] (!%p198_p8) }
  0x1e   : > { %v499_v29 = vpack.c.bf16 (!%p198_p8), %v261_v26, %v259_v25  ;;  %v501_v30 = vpack.c.bf16 (!%p198_p8), %v266_v28, %v264_v27  ;;  %v263_v31 = vld [vmem:[%s807_s1 + $0x80] sm:$0xff] (!%p198_p8)  ;;  %v265_v32 = vld [vmem:[%s807_s1 + $0x90] sm:$0xff] (!%p198_p8)  ;;  %v268_v33 = vld [vmem:[%s807_s1 + $0xa8] sm:$0xff] (!%p198_p8) }
  0x1f   : > { %v270_v34 = vld [vmem:[%s807_s1 + $0xb8] sm:$0xff] (!%p198_p8)  ;;  %v503_v35 = vpack.c.bf16 (!%p198_p8), %v265_v32, %v263_v31  ;;  %v267_v37 = vld [vmem:[%s807_s1 + $0xa0] sm:$0xff] (!%p198_p8)  ;;  %v269_v38 = vld [vmem:[%s807_s1 + $0xb0] sm:$0xff] (!%p198_p8) }
  0x20   : > { %526 = vmatpush1.bf16.msra.mxu1 %v491_v17  ;;  %492 = vmatpush1.bf16.msra.mxu0 %v491_v17  ;;  %v505_v36 = vpack.c.bf16 %v270_v34, %v268_v33  ;;  %v272_v39 = vld [vmem:[%s807_s1 + $0xc8] sm:$0xff]  ;;  %v274_v40 = vld [vmem:[%s807_s1 + $0xd8] sm:$0xff]  ;;  %v507_v41 = vpack.c.bf16 %v269_v38, %v267_v37  ;;  %v271_v43 = vld [vmem:[%s807_s1 + $0xc0] sm:$0xff]  ;;  %s817_s14 = smov (!%p234_p9, %s607_s14), 3 }
  0x21   : > { %519 = vmatprep.subr.bf16.mxu1 %v493_v18  ;;  %494 = vmatprep.subr.bf16.mxu0 %v493_v18  ;;  %v509_v42 = vpack.c.bf16 %v274_v40, %v272_v39  ;;  %v273_v44 = vld [vmem:[%s807_s1 + $0xd0] sm:$0xff]  ;;  %v276_v45 = vld [vmem:[%s807_s1 + $0xe8] sm:$0xff]  ;;  %v278_v46 = vld [vmem:[%s807_s1 + $0xf8] sm:$0xff]  ;;  %s535_s9 = smul.u32 48, %s817_s14 }
  0x22   : > { %v511_v47 = vpack.c.bf16 %v273_v44, %v271_v43  ;;  %v513_v48 = vpack.c.bf16 %v278_v46, %v276_v45  ;;  %v275_v49 = vld [vmem:[%s807_s1 + $0xe0] sm:$0xff]  ;;  %v277_v50 = vld [vmem:[%s807_s1 + $0xf0] sm:$0xff] }
  0x23   : > { %v515_v51 = vpack.c.bf16 %v277_v50, %v275_v49  ;;  %v245_v52 = vld [vmem:[%s206_s12 + $0x8] sm:$0xff]  ;;  %v244_v53 = vld [vmem:[%s206_s12] sm:$0xff]  ;;  %v246_v54 = vld [vmem:[%s206_s12 + $0x10] sm:$0xff]  ;;  %s242_s18 = scalar_lea.vmem %s809_s3, %s535_s9 }
  0x24   : > { %527 = vmatpush1.bf16.msra.mxu1 %v495_v23  ;;  %496 = vmatpush1.bf16.msra.mxu0 %v495_v23  ;;  %v279_v58 = vld [vmem:[%s808_s2] sm:$0x3] }
  0x25   : > { %520 = vmatprep.subr.bf16.mxu1 %v497_v24  ;;  %498 = vmatprep.subr.bf16.mxu0 %v497_v24  ;;  %v284_v60 = vrot.slane %v279_v58, %v283_v57  ;;  %v288_v61 = vrot.slane %v279_v58, %v287_v59 }
  0x28   : > { %528 = vmatpush1.bf16.msra.mxu1 %v499_v29  ;;  %500 = vmatpush1.bf16.msra.mxu0 %v499_v29 }
  0x29   : > { %521 = vmatprep.subr.bf16.mxu1 %v501_v30  ;;  %502 = vmatprep.subr.bf16.mxu0 %v501_v30 }
  0x2c   : > { %529 = vmatpush1.bf16.msra.mxu1 %v503_v35  ;;  %504 = vmatpush1.bf16.msra.mxu0 %v503_v35 }
  0x2d   : > { %522 = vmatprep.subr.bf16.mxu1 %v505_v36  ;;  %506 = vmatprep.subr.bf16.mxu0 %v505_v36 }
  0x30   : > { %530 = vmatpush1.bf16.msra.mxu1 %v507_v41  ;;  %508 = vmatpush1.bf16.msra.mxu0 %v507_v41 }
  0x31   : > { %523 = vmatprep.subr.bf16.mxu1 %v509_v42  ;;  %510 = vmatprep.subr.bf16.mxu0 %v509_v42 }
  0x34   : > { %531 = vmatpush1.bf16.msra.mxu1 %v511_v47  ;;  %512 = vmatpush1.bf16.msra.mxu0 %v511_v47 }
  0x35   : > { %524 = vmatprep.subr.bf16.mxu1 %v513_v48  ;;  %514 = vmatprep.subr.bf16.mxu0 %v513_v48 }
  0x38   : > { %532 = vmatpush1.bf16.msra.mxu1 %v515_v51  ;;  %516 = vmatpush1.bf16.msra.mxu0 %v515_v51 }
  0x3b   : > { %362 = vmatmul.mubr.f32.vlgmr.msra.gmra.mrb[0].mxu1 %v245_v52  ;;  %356 = vmatmul.mubr.f32.vlgmr.msra.gmra.mrb[0].mxu0 %v244_v53 }
  0x3c   : > { %367 = vmatprep.mubr.f32.mxu1 %v617_v10 }
  0x3f   : > { %368 = vmatmul.mubr.f32.gmra.mrb[2].mxu1 %v246_v54 }
 0x10e   : > { %v363_v62 = vpop.f32.mrb[0].mxu1  ;;  %v357_v63 = vpop.f32.mrb[0].mxu0 }
 0x10f   : > { %v364_v0 = vadd.f32 %v363_v62, %v284_v60  ;;  %v365_v1 = vpop.f32.mrb[1].mxu1  ;;  %v358_v2 = vadd.f32 %v357_v63, %v284_v60  ;;  %v359_v3 = vpop.f32.mrb[1].mxu0 }
 0x110   : > { %v366_v4 = vadd.f32 %v365_v1, %v288_v61  ;;  %v360_v5 = vadd.f32 %v359_v3, %v288_v61 }
 0x111   : > { %377 = vst [vmem:[%s242_s18 + $0x10] sm:$0xff] %v364_v0  ;;  %374 = vst [vmem:[%s242_s18] sm:$0xff] %v358_v2 }
 0x112   : > { %378 = vst.msk [vmem:[%s242_s18 + $0x18] sm:$0xff] %vm375_vm0, %v366_v4  ;;  %376 = vst.msk [vmem:[%s242_s18 + $0x8] sm:$0xff] %vm375_vm0, %v360_v5  ;;  %v369_v6 = vpop.f32.mrb[2].mxu1 }
 0x113   : > { %v370_v7 = vadd.f32 %v369_v6, %v284_v60  ;;  %v371_v8 = vpop.f32.mrb[3].mxu1 }
 0x114   : > { %v372_v9 = vadd.f32 %v371_v8, %v288_v61 }
 0x115   : > { %379 = vst [vmem:[%s242_s18 + $0x20] sm:$0xff] %v370_v7 }
 0x116   : > { %380 = vst.msk [vmem:[%s242_s18 + $0x28] sm:$0xff] %vm375_vm0, %v372_v9 }
 0x117 PF: > { %s13_s16 = sadd.s32 1, %s615_s16   ;;  %s810_s12 = smov %s603_s13 }
 0x118   : > { %p10_p10 = scmp.ge.s32.totalorder %s13_s16, 6   ;;  %s811_s13 = smov %s673_s20 }
 0x119   : > { %s812_s14 = smov %s611_s15  ;;  %s813_s15 = smov %s815_s17 }
 0x11a   :  { %12 = sbr.rel (!%p10_p10) target bundleno = 3 (0x3), region = 105 }

</bundles_post_ra>
